<compile_context>
chip_gen: v7x
topology: tpu7x:2x2x1
jax: 0.10.0
libtpu: 0.0.40
codegen_flags: <defaults>
</compile_context>

<pallas_src>
import functools

import jax
import jax.numpy as jnp
from jax.experimental import pallas as pl
from jax.experimental.pallas import tpu as pltpu

LANE = 128
SUBLANE_BF16 = 16  # bf16 vregs hold (16, 128): keep batch tiles 16-row aligned


def _round_up(n, m):
    return ((n + m - 1) // m) * m


def _vmem_cap_bytes():
    """~3/4 of physical VMEM: ~48 MiB on v7x (64 MiB), ~96 MiB on v5e/v6e."""
    try:
        cap = int(pltpu.get_tpu_info().vmem_capacity_bytes)
    except Exception:
        cap = 64 << 20  # conservative fallback (v7x-sized VMEM)
    return (cap * 3) // 4


# --------------------------------------------------------------------------- #
# Kernel
# --------------------------------------------------------------------------- #
def mlp_kernel(x_ref, *refs):
    """Fused MLP. refs = (w1, b1, ..., w5, b5, out). All param tiles VMEM-resident."""
    o_ref = refs[-1]
    param_refs = refs[:-1]
    n_layers = len(param_refs) // 2

    h = x_ref[...]                        # bf16 activations (block_b, D_in or H_p)
    for i in range(n_layers):             # static Python unroll (5 layers)
        w = param_refs[2 * i][...]        # bf16 weights, lane-dense out dims
        b = param_refs[2 * i + 1][...]    # f32 bias (1, out_p), broadcast on add
        h = jnp.dot(h, w, preferred_element_type=jnp.float32) + b
        if i < n_layers - 1:
            h = jnp.maximum(h, 0.0).astype(w.dtype)   # ReLU in f32, bf16 for next MXU
    o_ref[...] = h.astype(o_ref.dtype)


# --------------------------------------------------------------------------- #
# One-time parameter preparation (out of the per-call hot path)
# --------------------------------------------------------------------------- #
def prepare_params(params, compute_dtype=jnp.bfloat16):
    """params: list of (W [in, out], b [1, out]) f32 (already x@W+b orientation).

    Pads each *output* dim to a multiple of 128 lanes (exact: zero columns /
    zero bias, and zero rows on the next layer's weight).  D_in is not padded.
    Returns list of (W_p bf16, b_p f32).
    """
    padded = []
    in_p = params[0][0].shape[0]          # real D_in, unpadded
    for (w, b) in params:
        fi, fo = w.shape
        out_p = _round_up(fo, LANE)
        w_p = jnp.zeros((in_p, out_p), compute_dtype).at[:fi, :fo].set(
            w.astype(compute_dtype))
        b_p = jnp.zeros((1, out_p), jnp.float32).at[:, :fo].set(
            b.astype(jnp.float32))
        padded.append((w_p, b_p))
        in_p = out_p
    return padded


# --------------------------------------------------------------------------- #
# Forward wrapper (jit this)
# --------------------------------------------------------------------------- #
def my_one_forward(x, padded_params, *, d_out, block_b=None,
                   compute_dtype=jnp.bfloat16, store_dtype=jnp.bfloat16):
    """x: [B, D_in] f32.  padded_params: output of prepare_params().

    Returns [B, d_out] f32, matching PyTorch MyOne.forward semantics
    (bf16 matmul inputs, f32 accumulation).
    """
    B, D_in = x.shape
    assert D_in == padded_params[0][0].shape[0], "x feature dim mismatch"
    D_out_p = padded_params[-1][0].shape[1]
    max_out_p = max(w.shape[1] for (w, _) in padded_params)

    x_c = x.astype(compute_dtype)

    # --- batch tiling: 16-row aligned, >= 2 grid steps once B >= 32 ----------
    if block_b is None:
        if B >= 32:
            block_b = min(512, _round_up(pl.cdiv(B, 2), SUBLANE_BF16))
        else:
            block_b = B
    block_b = min(block_b, B)
    if block_b < B:
        block_b = max(SUBLANE_BF16, (block_b // SUBLANE_BF16) * SUBLANE_BF16)
    grid = (pl.cdiv(B, block_b),)

    # --- VMEM budget (double-buffer counted once) ----------------------------
    bpe_c = jnp.dtype(compute_dtype).itemsize
    bpe_s = jnp.dtype(store_dtype).itemsize
    w_bytes = sum(w.size * w.dtype.itemsize + b.size * b.dtype.itemsize
                  for (w, b) in padded_params)
    x_tile_bytes = block_b * D_in * bpe_c
    out_tile_bytes = block_b * D_out_p * bpe_s
    act_bytes = 2 * block_b * max_out_p * 4          # live f32 result + bf16 copy
    vmem_bytes = 2 * (x_tile_bytes + out_tile_bytes) + 2 * w_bytes + act_bytes
    vmem_limit = int(min(max(vmem_bytes + (2 << 20), 4 << 20), _vmem_cap_bytes()))

    # --- cost estimate (what the MXU / DMA actually move) ---------------------
    flops = 2 * B * sum(int(w.shape[0]) * int(w.shape[1])
                        for (w, _) in padded_params)
    bytes_accessed = int(
        x_c.size * bpe_c + w_bytes + B * D_out_p * bpe_s)
    cost = pl.CostEstimate(flops=flops, transcendentals=0,
                           bytes_accessed=bytes_accessed)

    # --- specs ----------------------------------------------------------------
    in_specs = [pl.BlockSpec((block_b, D_in), lambda i: (i, 0))]
    flat_args = [x_c]
    for (w_p, b_p) in padded_params:
        in_specs.append(pl.BlockSpec(w_p.shape, lambda i: (0, 0)))   # resident, DMA'd once
        in_specs.append(pl.BlockSpec(b_p.shape, lambda i: (0, 0)))
        flat_args.extend([w_p, b_p])
    out_spec = pl.BlockSpec((block_b, D_out_p), lambda i: (i, 0))

    out_p = pl.pallas_call(
        mlp_kernel,
        out_shape=jax.ShapeDtypeStruct((B, D_out_p), store_dtype),
        grid_spec=pl.GridSpec(grid=grid, in_specs=in_specs, out_specs=out_spec),
        compiler_params=pltpu.CompilerParams(
            dimension_semantics=("parallel",),   # batch tiles shard across v7x TCs
            vmem_limit_bytes=vmem_limit,
        ),
        cost_estimate=cost,
    )(*flat_args)

    # Slice off padded columns and upcast; cheap, fused under jit.
    return out_p[:, :d_out].astype(jnp.float32)


# --------------------------------------------------------------------------- #
# Init + references
# --------------------------------------------------------------------------- #
def init_params(key, dims):
    """torch.nn.Linear-style init (uniform +-1/sqrt(fan_in)); W is [in, out]."""
    params = []
    for i in range(len(dims) - 1):
        fan_in, fan_out = dims[i], dims[i + 1]
        key, kw, kb = jax.random.split(key, 3)
        bound = 1.0 / jnp.sqrt(jnp.float32(fan_in))
        w = jax.random.uniform(kw, (fan_in, fan_out), jnp.float32, -bound, bound)
        b = jax.random.uniform(kb, (1, fan_out), jnp.float32, -bound, bound)
        params.append((w, b))
    return params


def reference_forward_matched(x, params, compute_dtype=jnp.bfloat16,
                              store_dtype=jnp.bfloat16):
    """Same bf16-input / f32-accumulate / bf16-store numerics as the kernel."""
    h = x.astype(compute_dtype)
    for i, (w, b) in enumerate(params):
        h = jnp.dot(h, w.astype(compute_dtype),
                    preferred_element_type=jnp.float32) + b.astype(jnp.float32)
        if i < len(params) - 1:
            h = jnp.maximum(h, 0.0).astype(compute_dtype)
    return h.astype(store_dtype).astype(jnp.float32)


def reference_forward_f32(x, params):
    h = x
    for i, (w, b) in enumerate(params):
        h = h @ w + b
        if i < len(params) - 1:
            h = jnp.maximum(h, 0.0)
    return h


# --------------------------------------------------------------------------- #
if __name__ == "__main__":
    # MyOne(D_in=32, H1=64, H2=64, H3=64, H4=64, D_out=16)
    D_in, H1, H2, H3, H4, D_out = 32, 64, 64, 64, 64, 16

    key = jax.random.PRNGKey(0)
    key, kx = jax.random.split(key)
    params = init_params(key, (D_in, H1, H2, H3, H4, D_out))

    # One-time padding, outside the per-call hot path.
    padded = prepare_params(params)

    fwd = jax.jit(my_one_forward,
                  static_argnames=("d_out", "block_b", "compute_dtype",
                                   "store_dtype"))

    # Small batch (grid = 1).
    B = 8
    x = jax.random.normal(kx, (B, D_in), jnp.float32)
    out = jax.block_until_ready(fwd(x, padded, d_out=D_out))
    assert out.shape == (B, D_out), out.shape
    ref_m = reference_forward_matched(x, params)
    ref_f = reference_forward_f32(x, params)
    assert jnp.allclose(out, ref_m, atol=1e-2, rtol=1e-2), \
        "mismatch vs matched-precision reference"
    assert jnp.allclose(out, ref_f, atol=5e-2, rtol=5e-2), \
        "mismatch vs f32 reference"

    # Larger batch: exercises grid > 1 (both v7x TensorCores) + ragged last tile.
    B2 = 100
    key, kx2 = jax.random.split(key)
    x2 = jax.random.normal(kx2, (B2, D_in), jnp.float32)
    out2 = jax.block_until_ready(fwd(x2, padded, d_out=D_out))
    assert out2.shape == (B2, D_out), out2.shape
    ref2 = reference_forward_matched(x2, params)
    assert jnp.allclose(out2, ref2, atol=1e-2, rtol=1e-2), \
        "mismatch vs matched-precision reference (ragged grid)"

    print("KERNEL_OK")
</pallas_src>

<mosaic_0001>
module attributes {stable_mosaic.version = 11 : i64} {
  func.func @mlp_kernel(%arg0: i32, %arg1: memref<8x32xbf16, #tpu.memory_space<vmem>>, %arg2: memref<32x128xbf16, #tpu.memory_space<vmem>>, %arg3: memref<1x128xf32, #tpu.memory_space<vmem>>, %arg4: memref<128x128xbf16, #tpu.memory_space<vmem>>, %arg5: memref<1x128xf32, #tpu.memory_space<vmem>>, %arg6: memref<128x128xbf16, #tpu.memory_space<vmem>>, %arg7: memref<1x128xf32, #tpu.memory_space<vmem>>, %arg8: memref<128x128xbf16, #tpu.memory_space<vmem>>, %arg9: memref<1x128xf32, #tpu.memory_space<vmem>>, %arg10: memref<128x128xbf16, #tpu.memory_space<vmem>>, %arg11: memref<1x128xf32, #tpu.memory_space<vmem>>, %arg12: memref<8x128xbf16, #tpu.memory_space<vmem>>) attributes {dimension_semantics = [#tpu.dimension_semantics<parallel>], iteration_bounds = array<i64: 1>, scalar_prefetch = 0 : i64, scratch_operands = 0 : i64, tpu.core_type = #tpu.core_type<tc>, window_params = [{transform_indices = @transform_0, window_bounds = array<i64: 8, 32>}, {pipeline_mode = #tpu.pipeline_mode<synchronous>, transform_indices = @transform_1, window_bounds = array<i64: 32, 128>}, {pipeline_mode = #tpu.pipeline_mode<synchronous>, transform_indices = @transform_2, window_bounds = array<i64: 1, 128>}, {pipeline_mode = #tpu.pipeline_mode<synchronous>, transform_indices = @transform_3, window_bounds = array<i64: 128, 128>}, {pipeline_mode = #tpu.pipeline_mode<synchronous>, transform_indices = @transform_4, window_bounds = array<i64: 1, 128>}, {pipeline_mode = #tpu.pipeline_mode<synchronous>, transform_indices = @transform_5, window_bounds = array<i64: 128, 128>}, {pipeline_mode = #tpu.pipeline_mode<synchronous>, transform_indices = @transform_6, window_bounds = array<i64: 1, 128>}, {pipeline_mode = #tpu.pipeline_mode<synchronous>, transform_indices = @transform_7, window_bounds = array<i64: 128, 128>}, {pipeline_mode = #tpu.pipeline_mode<synchronous>, transform_indices = @transform_8, window_bounds = array<i64: 1, 128>}, {pipeline_mode = #tpu.pipeline_mode<synchronous>, transform_indices = @transform_9, window_bounds = array<i64: 128, 128>}, {pipeline_mode = #tpu.pipeline_mode<synchronous>, transform_indices = @transform_10, window_bounds = array<i64: 1, 128>}, {transform_indices = @transform_11, window_bounds = array<i64: 8, 128>}]} {
    %c0 = arith.constant 0 : index
    %c0_0 = arith.constant 0 : index
    %0 = vector.load %arg1[%c0, %c0_0] : memref<8x32xbf16, #tpu.memory_space<vmem>>, vector<8x32xbf16>
    %c0_1 = arith.constant 0 : index
    %c0_2 = arith.constant 0 : index
    %1 = vector.load %arg2[%c0_1, %c0_2] : memref<32x128xbf16, #tpu.memory_space<vmem>>, vector<32x128xbf16>
    %c0_3 = arith.constant 0 : index
    %c0_4 = arith.constant 0 : index
    %2 = vector.load %arg3[%c0_3, %c0_4] : memref<1x128xf32, #tpu.memory_space<vmem>>, vector<1x128xf32>
    %cst = arith.constant dense<0.000000e+00> : vector<8x128xf32>
    %3 = tpu.matmul %0, %1, %cst {dimension_numbers = #tpu.dot_dimension_numbers<[1], [0], [0], [1], [0, 0, 1, 1], [], []>} : vector<8x32xbf16>, vector<32x128xbf16>, vector<8x128xf32> -> vector<8x128xf32>
    %4 = vector.broadcast %2 : vector<1x128xf32> to vector<8x128xf32>
    %5 = arith.addf %3, %4 : vector<8x128xf32>
    %cst_5 = arith.constant 0.000000e+00 : f32
    %6 = vector.broadcast %cst_5 : f32 to vector<8x128xf32>
    %7 = arith.maximumf %5, %6 : vector<8x128xf32>
    %8 = arith.truncf %7 : vector<8x128xf32> to vector<8x128xbf16>
    %c0_6 = arith.constant 0 : index
    %c0_7 = arith.constant 0 : index
    %9 = vector.load %arg4[%c0_6, %c0_7] : memref<128x128xbf16, #tpu.memory_space<vmem>>, vector<128x128xbf16>
    %c0_8 = arith.constant 0 : index
    %c0_9 = arith.constant 0 : index
    %10 = vector.load %arg5[%c0_8, %c0_9] : memref<1x128xf32, #tpu.memory_space<vmem>>, vector<1x128xf32>
    %cst_10 = arith.constant dense<0.000000e+00> : vector<8x128xf32>
    %11 = tpu.matmul %8, %9, %cst_10 {dimension_numbers = #tpu.dot_dimension_numbers<[1], [0], [0], [1], [0, 0, 1, 1], [], []>} : vector<8x128xbf16>, vector<128x128xbf16>, vector<8x128xf32> -> vector<8x128xf32>
    %12 = vector.broadcast %10 : vector<1x128xf32> to vector<8x128xf32>
    %13 = arith.addf %11, %12 : vector<8x128xf32>
    %cst_11 = arith.constant 0.000000e+00 : f32
    %14 = vector.broadcast %cst_11 : f32 to vector<8x128xf32>
    %15 = arith.maximumf %13, %14 : vector<8x128xf32>
    %16 = arith.truncf %15 : vector<8x128xf32> to vector<8x128xbf16>
    %c0_12 = arith.constant 0 : index
    %c0_13 = arith.constant 0 : index
    %17 = vector.load %arg6[%c0_12, %c0_13] : memref<128x128xbf16, #tpu.memory_space<vmem>>, vector<128x128xbf16>
    %c0_14 = arith.constant 0 : index
    %c0_15 = arith.constant 0 : index
    %18 = vector.load %arg7[%c0_14, %c0_15] : memref<1x128xf32, #tpu.memory_space<vmem>>, vector<1x128xf32>
    %cst_16 = arith.constant dense<0.000000e+00> : vector<8x128xf32>
    %19 = tpu.matmul %16, %17, %cst_16 {dimension_numbers = #tpu.dot_dimension_numbers<[1], [0], [0], [1], [0, 0, 1, 1], [], []>} : vector<8x128xbf16>, vector<128x128xbf16>, vector<8x128xf32> -> vector<8x128xf32>
    %20 = vector.broadcast %18 : vector<1x128xf32> to vector<8x128xf32>
    %21 = arith.addf %19, %20 : vector<8x128xf32>
    %cst_17 = arith.constant 0.000000e+00 : f32
    %22 = vector.broadcast %cst_17 : f32 to vector<8x128xf32>
    %23 = arith.maximumf %21, %22 : vector<8x128xf32>
    %24 = arith.truncf %23 : vector<8x128xf32> to vector<8x128xbf16>
    %c0_18 = arith.constant 0 : index
    %c0_19 = arith.constant 0 : index
    %25 = vector.load %arg8[%c0_18, %c0_19] : memref<128x128xbf16, #tpu.memory_space<vmem>>, vector<128x128xbf16>
    %c0_20 = arith.constant 0 : index
    %c0_21 = arith.constant 0 : index
    %26 = vector.load %arg9[%c0_20, %c0_21] : memref<1x128xf32, #tpu.memory_space<vmem>>, vector<1x128xf32>
    %cst_22 = arith.constant dense<0.000000e+00> : vector<8x128xf32>
    %27 = tpu.matmul %24, %25, %cst_22 {dimension_numbers = #tpu.dot_dimension_numbers<[1], [0], [0], [1], [0, 0, 1, 1], [], []>} : vector<8x128xbf16>, vector<128x128xbf16>, vector<8x128xf32> -> vector<8x128xf32>
    %28 = vector.broadcast %26 : vector<1x128xf32> to vector<8x128xf32>
    %29 = arith.addf %27, %28 : vector<8x128xf32>
    %cst_23 = arith.constant 0.000000e+00 : f32
    %30 = vector.broadcast %cst_23 : f32 to vector<8x128xf32>
    %31 = arith.maximumf %29, %30 : vector<8x128xf32>
    %32 = arith.truncf %31 : vector<8x128xf32> to vector<8x128xbf16>
    %c0_24 = arith.constant 0 : index
    %c0_25 = arith.constant 0 : index
    %33 = vector.load %arg10[%c0_24, %c0_25] : memref<128x128xbf16, #tpu.memory_space<vmem>>, vector<128x128xbf16>
    %c0_26 = arith.constant 0 : index
    %c0_27 = arith.constant 0 : index
    %34 = vector.load %arg11[%c0_26, %c0_27] : memref<1x128xf32, #tpu.memory_space<vmem>>, vector<1x128xf32>
    %cst_28 = arith.constant dense<0.000000e+00> : vector<8x128xf32>
    %35 = tpu.matmul %32, %33, %cst_28 {dimension_numbers = #tpu.dot_dimension_numbers<[1], [0], [0], [1], [0, 0, 1, 1], [], []>} : vector<8x128xbf16>, vector<128x128xbf16>, vector<8x128xf32> -> vector<8x128xf32>
    %36 = vector.broadcast %34 : vector<1x128xf32> to vector<8x128xf32>
    %37 = arith.addf %35, %36 : vector<8x128xf32>
    %38 = arith.truncf %37 : vector<8x128xf32> to vector<8x128xbf16>
    %c0_29 = arith.constant 0 : index
    %c0_30 = arith.constant 0 : index
    %39 = vector.load %arg12[%c0_29, %c0_30] : memref<8x128xbf16, #tpu.memory_space<vmem>>, vector<8x128xbf16>
    tpu.vector_store %arg12[%c0_29, %c0_30], %38 {strides = array<i32>} : memref<8x128xbf16, #tpu.memory_space<vmem>>, vector<8x128xbf16>,
    return
  }
  func.func @transform_0(%arg0: i32) -> (i32, i32) {
    %c0_i32 = arith.constant 0 : i32
    %c0_i32_0 = arith.constant 0 : i32
    return %arg0, %c0_i32 : i32, i32
  }
  func.func @transform_1(%arg0: i32) -> (i32, i32) {
    %c0_i32 = arith.constant 0 : i32
    %c0_i32_0 = arith.constant 0 : i32
    %c0_i32_1 = arith.constant 0 : i32
    return %c0_i32, %c0_i32_0 : i32, i32
  }
  func.func @transform_2(%arg0: i32) -> (i32, i32) {
    %c0_i32 = arith.constant 0 : i32
    %c0_i32_0 = arith.constant 0 : i32
    %c0_i32_1 = arith.constant 0 : i32
    return %c0_i32, %c0_i32_0 : i32, i32
  }
  func.func @transform_3(%arg0: i32) -> (i32, i32) {
    %c0_i32 = arith.constant 0 : i32
    %c0_i32_0 = arith.constant 0 : i32
    %c0_i32_1 = arith.constant 0 : i32
    return %c0_i32, %c0_i32_0 : i32, i32
  }
  func.func @transform_4(%arg0: i32) -> (i32, i32) {
    %c0_i32 = arith.constant 0 : i32
    %c0_i32_0 = arith.constant 0 : i32
    %c0_i32_1 = arith.constant 0 : i32
    return %c0_i32, %c0_i32_0 : i32, i32
  }
  func.func @transform_5(%arg0: i32) -> (i32, i32) {
    %c0_i32 = arith.constant 0 : i32
    %c0_i32_0 = arith.constant 0 : i32
    %c0_i32_1 = arith.constant 0 : i32
    return %c0_i32, %c0_i32_0 : i32, i32
  }
  func.func @transform_6(%arg0: i32) -> (i32, i32) {
    %c0_i32 = arith.constant 0 : i32
    %c0_i32_0 = arith.constant 0 : i32
    %c0_i32_1 = arith.constant 0 : i32
    return %c0_i32, %c0_i32_0 : i32, i32
  }
  func.func @transform_7(%arg0: i32) -> (i32, i32) {
    %c0_i32 = arith.constant 0 : i32
    %c0_i32_0 = arith.constant 0 : i32
    %c0_i32_1 = arith.constant 0 : i32
    return %c0_i32, %c0_i32_0 : i32, i32
  }
  func.func @transform_8(%arg0: i32) -> (i32, i32) {
    %c0_i32 = arith.constant 0 : i32
    %c0_i32_0 = arith.constant 0 : i32
    %c0_i32_1 = arith.constant 0 : i32
    return %c0_i32, %c0_i32_0 : i32, i32
  }
  func.func @transform_9(%arg0: i32) -> (i32, i32) {
    %c0_i32 = arith.constant 0 : i32
    %c0_i32_0 = arith.constant 0 : i32
    %c0_i32_1 = arith.constant 0 : i32
    return %c0_i32, %c0_i32_0 : i32, i32
  }
  func.func @transform_10(%arg0: i32) -> (i32, i32) {
    %c0_i32 = arith.constant 0 : i32
    %c0_i32_0 = arith.constant 0 : i32
    %c0_i32_1 = arith.constant 0 : i32
    return %c0_i32, %c0_i32_0 : i32, i32
  }
  func.func @transform_11(%arg0: i32) -> (i32, i32) {
    %c0_i32 = arith.constant 0 : i32
    %c0_i32_0 = arith.constant 0 : i32
    return %arg0, %c0_i32 : i32, i32
  }
}

</mosaic_0001>

<bundles_post_ra>
// kernel: my_one_forward.1
= control target key start
LH: loop header
LB: loop body
LE: loop exit
PB: predicated region body
PF: predicated region fallthrough
CT: control target
= control target key end

     0   :  { %16 = vsyncpa [#allocation3], 0  ;;  %s1185_s0 = inlined_call_operand.vmem [shape: bf16[8,32], index: 0, kind: input, shape index: {}]   ;;  %s1186_s1 = inlined_call_operand.hbm [shape: bf16[32,128], index: 1, kind: input, shape index: {}]   ;;  %s1187_s2 = inlined_call_operand.vmem [shape: f32[1,128], index: 2, kind: input, shape index: {}]   ;;  %s1188_s3 = inlined_call_operand.hbm [shape: bf16[128,128], index: 3, kind: input, shape index: {}]   ;;  %s1189_s4 = inlined_call_operand.vmem [shape: f32[1,128], index: 4, kind: input, shape index: {}]   ;;  %s1190_s5 = inlined_call_operand.hbm [shape: bf16[128,128], index: 5, kind: input, shape index: {}]   ;;  %s1191_s6 = inlined_call_operand.vmem [shape: f32[1,128], index: 6, kind: input, shape index: {}]   ;;  %s1192_s7 = inlined_call_operand.hbm [shape: bf16[128,128], index: 7, kind: input, shape index: {}]   ;;  %s1193_s8 = inlined_call_operand.vmem [shape: f32[1,128], index: 8, kind: input, shape index: {}]   ;;  %s1194_s9 = inlined_call_operand.hbm [shape: bf16[128,128], index: 9, kind: input, shape index: {}]   ;;  %s1195_s10 = inlined_call_operand.vmem [shape: f32[1,128], index: 10, kind: input, shape index: {}]   ;;  %s1196_s11 = inlined_call_operand.vmem [shape: bf16[8,128], index: 11, kind: output, shape index: {}]  }
   0x1   :  { %17 = vsyncpa [#allocation5], 0 }
   0x2   :  { %18 = vsyncpa [#allocation8], 0  ;;  %s962_s17 = smov [#allocation4]   ;;  %s963_s19 = smov [#allocation7]  }
   0x3   :  { %s40_s18 = sshll.u32 %s962_s17, 4  ;;  %s68_s20 = sshll.u32 %s963_s19, 4  ;;  %s41_s18 = int_to_ptr.vmem [resolvable:$true] %s40_s18  ;;  %s1031_s20 = int_to_ptr.vmem [resolvable:$true] %s68_s20 }
   0x4   :  { %s846_s23 = scalar_lea.hbm %s1188_s3, 1024 }
   0x5   :  { %p847_p0 = scmp.ne.s32.totalorder %s1188_s3, %s846_s23  ;;  %p850_p1 = scmp.lt.u32.totalorder %s846_s23, %s1188_s3 }
   0x7   :  { %p852_p2 = pnand %p850_p1, %p847_p0 }
   0x9   :  { %855 = shalt.err (!%p852_p2)
}
   0xa   :  { %s856_s28 = scalar_lea.vmem %s41_s18, 1024  ;;  %p861_p4 = scmp.lt.s32.totalorder %s41_s18, %s41_s18 }
   0xb   :  { %p857_p3 = scmp.ne.s32.totalorder %s41_s18, %s856_s28  ;;  %p862_p5 = scmp.lt.s32.totalorder %s856_s28, %s856_s28 }
   0xd   :  { %p863_p6 = por %p862_p5, %p861_p4 }
   0xf   :  { %p864_p7 = pnand %p863_p6, %p857_p3 }
  0x11   :  { %867 = shalt.err (!%p864_p7)
}
  0x12   :  { %s964_s29 = smov 64   ;;  %s965_s30 = smov 4  }
  0x13   :  { %46 = dma.hbm_to_vmem [thread:$0]  %s1188_s3, 1024, %s41_s18, [#allocation5], %s964_s29, %s964_s29, %s965_s30  }
  0x14   :  { %s868_s16 = scalar_lea.hbm %s1192_s7, 1024 }
  0x15   :  { %p869_p8 = scmp.ne.s32.totalorder %s1192_s7, %s868_s16  ;;  %p872_p9 = scmp.lt.u32.totalorder %s868_s16, %s1192_s7 }
  0x17   :  { %p874_p10 = pnand %p872_p9, %p869_p8 }
  0x19   :  { %877 = shalt.err (!%p874_p10)
}
  0x1a   :  { %s878_s23 = scalar_lea.vmem %s1031_s20, 1024  ;;  %p883_p12 = scmp.lt.s32.totalorder %s1031_s20, %s1031_s20 }
  0x1b   :  { %p879_p11 = scmp.ne.s32.totalorder %s1031_s20, %s878_s23  ;;  %p884_p13 = scmp.lt.s32.totalorder %s878_s23, %s878_s23 }
  0x1d   :  { %p885_p0 = por %p884_p13, %p883_p12 }
  0x1f   :  { %p886_p1 = pnand %p885_p0, %p879_p11 }
  0x21   :  { %889 = shalt.err (!%p886_p1)
}
  0x22   :  { %74 = dma.hbm_to_vmem [thread:$0]  %s1192_s7, 1024, %s1031_s20, [#allocation8], %s964_s29, %s964_s29, %s965_s30  }
  0x23   :  { %s966_s24 = smov [#allocation2]   ;;  %s967_s26 = smov [#allocation6]  }
  0x24   :  { %s26_s25 = sshll.u32 %s966_s24, 4  ;;  %s54_s27 = sshll.u32 %s967_s26, 4  ;;  %s27_s25 = int_to_ptr.vmem [resolvable:$true] %s26_s25  ;;  %s1068_s27 = int_to_ptr.vmem [resolvable:$true] %s54_s27 }
  0x25   :  { %s890_s13 = scalar_lea.hbm %s1186_s1, 256 }
  0x26   :  { %p891_p2 = scmp.ne.s32.totalorder %s1186_s1, %s890_s13  ;;  %p894_p3 = scmp.lt.u32.totalorder %s890_s13, %s1186_s1 }
  0x28   :  { %p896_p4 = pnand %p894_p3, %p891_p2 }
  0x2a   :  { %899 = shalt.err (!%p896_p4)
}
  0x2b   :  { %s900_s7 = scalar_lea.vmem %s27_s25, 256  ;;  %p905_p6 = scmp.lt.s32.totalorder %s27_s25, %s27_s25 }
  0x2c   :  { %p901_p5 = scmp.ne.s32.totalorder %s27_s25, %s900_s7  ;;  %p906_p7 = scmp.lt.s32.totalorder %s900_s7, %s900_s7 }
  0x2e   :  { %p907_p8 = por %p906_p7, %p905_p6 }
  0x30   :  { %p908_p9 = pnand %p907_p8, %p901_p5 }
  0x32   :  { %911 = shalt.err (!%p908_p9)
}
  0x33   :  { %32 = dma.hbm_to_vmem [thread:$0]  %s1186_s1, 256, %s27_s25, [#allocation3], %s964_s29, %s964_s29, %s965_s30  }
  0x34   :  { %s912_s23 = scalar_lea.hbm %s1190_s5, 1024 }
  0x35   :  { %p913_p10 = scmp.ne.s32.totalorder %s1190_s5, %s912_s23  ;;  %p916_p11 = scmp.lt.u32.totalorder %s912_s23, %s1190_s5 }
  0x37   :  { %p918_p12 = pnand %p916_p11, %p913_p10 }
  0x39   :  { %921 = shalt.err (!%p918_p12)
}
  0x3a   :  { %s922_s28 = scalar_lea.vmem %s1068_s27, 1024  ;;  %p927_p0 = scmp.lt.s32.totalorder %s1068_s27, %s1068_s27 }
  0x3b   :  { %p923_p13 = scmp.ne.s32.totalorder %s1068_s27, %s922_s28  ;;  %p928_p1 = scmp.lt.s32.totalorder %s922_s28, %s922_s28 }
  0x3d   :  { %p929_p2 = por %p928_p1, %p927_p0 }
  0x3f   :  { %p930_p3 = pnand %p929_p2, %p923_p13 }
  0x41   :  { %933 = shalt.err (!%p930_p3)
}
  0x42   :  { %60 = dma.hbm_to_vmem [thread:$0]  %s1190_s5, 1024, %s1068_s27, [#allocation5], %s964_s29, %s964_s29, %s965_s30  }
  0x43   :  { %s968_s12 = smov [#allocation9]   ;;  %s934_s16 = scalar_lea.hbm %s1194_s9, 1024 }
  0x44   :  { %s82_s13 = sshll.u32 %s968_s12, 4  ;;  %p935_p4 = scmp.ne.s32.totalorder %s1194_s9, %s934_s16  ;;  %s83_s13 = int_to_ptr.vmem [resolvable:$true] %s82_s13 }
  0x45   :  { %p938_p5 = scmp.lt.u32.totalorder %s934_s16, %s1194_s9 }
  0x47   :  { %p940_p6 = pnand %p938_p5, %p935_p4 }
  0x49   :  { %943 = shalt.err (!%p940_p6)
}
  0x4a   :  { %s944_s21 = scalar_lea.vmem %s83_s13, 1024  ;;  %p949_p8 = scmp.lt.s32.totalorder %s83_s13, %s83_s13 }
  0x4b   :  { %p945_p7 = scmp.ne.s32.totalorder %s83_s13, %s944_s21  ;;  %p950_p9 = scmp.lt.s32.totalorder %s944_s21, %s944_s21 }
  0x4d   :  { %p951_p10 = por %p950_p9, %p949_p8 }
  0x4f   :  { %p952_p11 = pnand %p951_p10, %p945_p7 }
  0x51   :  { %955 = shalt.err (!%p952_p11)
}
  0x52   :  { %88 = dma.hbm_to_vmem [thread:$0]  %s1194_s9, 1024, %s83_s13, [#allocation8], %s964_s29, %s964_s29, %s965_s30  }
  0x53   :  { %956 = dma.done.wait [#allocation3], 256  }
  0x54   :  { %957 = vsyncadd [#allocation3], 4294967040 }
  0x55   :  { %958 = dma.done.wait [#allocation5], 2048  }
  0x56   :  { %959 = vsyncadd [#allocation5], 4294965248 }
  0x57   :  { %960 = dma.done.wait [#allocation8], 2048  }
  0x58   :  { %961 = vsyncadd [#allocation8], 4294965248  ;;  %v969_v0 = vmov 0.0   ;;  %vm970_vm0 = vmmov 0   ;;  %v812_v1 = vld [vmem:[#allocation2] sm:$0xff]   ;;  %v813_v2 = vld [vmem:[#allocation2 + $0x8] sm:$0xff]  }
  0x59   :  { %715 = vmatprep.subr.bf16.mxu0 %v969_v0  ;;  %719 = vmatprep.mubr.msk.bf16.mxu0 %vm970_vm0, %v969_v0  ;;  %v814_v3 = vld [vmem:[#allocation4] sm:$0xff]   ;;  %vm131_vm1 = vcmask 261120   ;;  %v815_v4 = vld [vmem:[#allocation4 + $0x8] sm:$0xff]   ;;  %v107_v5 = vld [vmem:[%s1185_s0] sm:$0xf] }
  0x5a   :  { %723 = vmatprep.subr.bf16.mxu1 %v969_v0  ;;  %739 = vmatprep.mubr.msk.bf16.mxu1 %vm970_vm0, %v969_v0  ;;  %v816_v6 = vld [vmem:[#allocation4 + $0x10] sm:$0xff]   ;;  %v817_v7 = vld [vmem:[#allocation4 + $0x18] sm:$0xff]   ;;  %v818_v8 = vld [vmem:[#allocation4 + $0x20] sm:$0xff]  }
  0x5b   :  { %716 = vmatpush3.bf16.msra.mxu0 %v812_v1  ;;  %724 = vmatpush3.bf16.msra.mxu1 %v814_v3  ;;  %v819_v9 = vld [vmem:[#allocation4 + $0x28] sm:$0xff]   ;;  %v820_v10 = vld [vmem:[#allocation4 + $0x30] sm:$0xff]   ;;  %v821_v11 = vld [vmem:[#allocation4 + $0x38] sm:$0xff]  }
  0x5c   :  { %717 = vmatprep.subr.bf16.mxu0 %v969_v0  ;;  %725 = vmatprep.subr.bf16.mxu1 %v969_v0  ;;  %v822_v12 = vld [vmem:[#allocation6] sm:$0xff]   ;;  %v823_v13 = vld [vmem:[#allocation6 + $0x8] sm:$0xff]   ;;  %v824_v14 = vld [vmem:[#allocation6 + $0x10] sm:$0xff]  }
  0x5d   :  { %v825_v15 = vld [vmem:[#allocation6 + $0x18] sm:$0xff]   ;;  %v826_v16 = vld [vmem:[#allocation6 + $0x20] sm:$0xff]   ;;  %v827_v17 = vld [vmem:[#allocation6 + $0x28] sm:$0xff]  }
  0x5e   :  { %v636_v18 = vld [vmem:[%s1187_s2] ss:$0 sm:$0xff]  ;;  %v829_v27 = vld [vmem:[#allocation6 + $0x38] sm:$0xff]   ;;  %v830_v28 = vld [vmem:[#allocation7] sm:$0xff]  }
  0x5f   :  { %718 = vmatpush3.bf16.msra.mxu0 %v813_v2  ;;  %726 = vmatpush3.bf16.msra.mxu1 %v815_v4  ;;  %v828_v26 = vld [vmem:[#allocation6 + $0x30] sm:$0xff]   ;;  %v831_v29 = vld [vmem:[#allocation7 + $0x8] sm:$0xff]   ;;  %v833_v31 = vld [vmem:[#allocation7 + $0x18] sm:$0xff]  }
  0x60   :  { %743 = vmatprep.subr.bf16.mxu0 %v969_v0  ;;  %727 = vmatprep.subr.bf16.mxu1 %v969_v0  ;;  %v832_v30 = vld [vmem:[#allocation7 + $0x10] sm:$0xff]   ;;  %v834_v32 = vld [vmem:[#allocation7 + $0x20] sm:$0xff]   ;;  %v835_v33 = vld [vmem:[#allocation7 + $0x28] sm:$0xff]  }
  0x61   :  { %v640_v34 = vld [vmem:[%s1189_s4] ss:$0 sm:$0xff]  ;;  %v837_v43 = vld [vmem:[#allocation7 + $0x38] sm:$0xff]   ;;  %v838_v44 = vld [vmem:[#allocation9] sm:$0xff]  }
  0x62   :  { %720 = vmatmul.mubr.msk.bf16.vlgmr.msra.gmra.mrb[0].mxu0 %vm131_vm1, %v107_v5  ;;  %v836_v42 = vld [vmem:[#allocation7 + $0x30] sm:$0xff]   ;;  %v839_v45 = vld [vmem:[#allocation9 + $0x8] sm:$0xff]   ;;  %v841_v47 = vld [vmem:[#allocation9 + $0x18] sm:$0xff]  }
  0x63   :  { %759 = vmatprep.mubr.msk.bf16.mxu0 %vm970_vm0, %v969_v0  ;;  %728 = vmatpush3.bf16.msra.mxu1 %v816_v6  ;;  %v840_v46 = vld [vmem:[#allocation9 + $0x10] sm:$0xff]   ;;  %v842_v48 = vld [vmem:[#allocation9 + $0x20] sm:$0xff]   ;;  %v843_v49 = vld [vmem:[#allocation9 + $0x28] sm:$0xff]  }
  0x64   :  { %729 = vmatprep.subr.bf16.mxu1 %v969_v0  ;;  %744 = vmatpush3.bf16.msra.mxu0 %v822_v12  ;;  %v649_v50 = vld [vmem:[%s1191_s6] ss:$0 sm:$0xff]  ;;  %v845_v59 = vld [vmem:[#allocation9 + $0x38] sm:$0xff]  }
  0x65   :  { %745 = vmatprep.subr.bf16.mxu0 %v969_v0  ;;  %v844_v58 = vld [vmem:[#allocation9 + $0x30] sm:$0xff]  }
  0x66   :  { %v658_v60 = vld [vmem:[%s1193_s8] ss:$0 sm:$0xff] }
  0x67   :  { %730 = vmatpush3.bf16.msra.mxu1 %v817_v7  ;;  %v667_v5 = vld [vmem:[%s1195_s10] ss:$0 sm:$0xff] }
  0x68   :  { %731 = vmatprep.subr.bf16.mxu1 %v969_v0  ;;  %746 = vmatpush3.bf16.msra.mxu0 %v823_v13 }
  0x69   :  { %747 = vmatprep.subr.bf16.mxu0 %v969_v0 }
  0x6b   :  { %732 = vmatpush3.bf16.msra.mxu1 %v818_v8 }
  0x6c   :  { %733 = vmatprep.subr.bf16.mxu1 %v969_v0  ;;  %748 = vmatpush3.bf16.msra.mxu0 %v824_v14 }
  0x6d   :  { %749 = vmatprep.subr.bf16.mxu0 %v969_v0 }
  0x6f   :  { %734 = vmatpush3.bf16.msra.mxu1 %v819_v9 }
  0x70   :  { %735 = vmatprep.subr.bf16.mxu1 %v969_v0  ;;  %750 = vmatpush3.bf16.msra.mxu0 %v825_v15 }
  0x71   :  { %751 = vmatprep.subr.bf16.mxu0 %v969_v0 }
  0x73   :  { %736 = vmatpush3.bf16.msra.mxu1 %v820_v10 }
  0x74   :  { %737 = vmatprep.subr.bf16.mxu1 %v969_v0  ;;  %752 = vmatpush3.bf16.msra.mxu0 %v826_v16 }
  0x75   :  { %753 = vmatprep.subr.bf16.mxu0 %v969_v0 }
  0x77   :  { %738 = vmatpush3.bf16.msra.mxu1 %v821_v11 }
  0x78   :  { %763 = vmatprep.subr.bf16.mxu1 %v969_v0  ;;  %754 = vmatpush3.bf16.msra.mxu0 %v827_v17 }
  0x79   :  { %755 = vmatprep.subr.bf16.mxu0 %v969_v0 }
  0x7c   :  { %756 = vmatpush3.bf16.msra.mxu0 %v828_v26 }
  0x7d   :  { %757 = vmatprep.subr.bf16.mxu0 %v969_v0 }
  0x80   :  { %758 = vmatpush3.bf16.msra.mxu0 %v829_v27 }
  0x81   :  { %783 = vmatprep.subr.bf16.mxu0 %v969_v0 }
 0x135   :  { %v169_v19 = vpop.f32.mrb[0].mxu0 }
 0x136   :  { %v170_v20 = vadd.f32 %v636_v18, %v169_v19  ;;  %v721_v21 = vpop.f32.mrb[1].mxu0 }
 0x137   :  { %v172_v22 = vpop.f32.mrb[2].mxu0 }
 0x138   :  { %v175_v23 = vmax.f32 %v170_v20, 0.0  ;;  %v722_v24 = vpop.f32.mrb[3].mxu0 }
 0x13a   :  { %v176_v25 = vpack.c.bf16 %v175_v23, %v175_v23 }
 0x13c   :  { %740 = vmatmul.mubr.bf16.vlgmr.msra.gmra.mrb[0].mxu1 %v176_v25 }
 0x13d   :  { %779 = vmatprep.mubr.msk.bf16.mxu1 %vm970_vm0, %v969_v0  ;;  %764 = vmatpush3.bf16.msra.mxu1 %v830_v28 }
 0x13e   :  { %765 = vmatprep.subr.bf16.mxu1 %v969_v0 }
 0x141   :  { %766 = vmatpush3.bf16.msra.mxu1 %v831_v29 }
 0x142   :  { %767 = vmatprep.subr.bf16.mxu1 %v969_v0 }
 0x145   :  { %768 = vmatpush3.bf16.msra.mxu1 %v832_v30 }
 0x146   :  { %769 = vmatprep.subr.bf16.mxu1 %v969_v0 }
 0x149   :  { %770 = vmatpush3.bf16.msra.mxu1 %v833_v31 }
 0x14a   :  { %771 = vmatprep.subr.bf16.mxu1 %v969_v0 }
 0x14d   :  { %772 = vmatpush3.bf16.msra.mxu1 %v834_v32 }
 0x14e   :  { %773 = vmatprep.subr.bf16.mxu1 %v969_v0 }
 0x151   :  { %774 = vmatpush3.bf16.msra.mxu1 %v835_v33 }
 0x152   :  { %775 = vmatprep.subr.bf16.mxu1 %v969_v0 }
 0x155   :  { %776 = vmatpush3.bf16.msra.mxu1 %v836_v42 }
 0x156   :  { %777 = vmatprep.subr.bf16.mxu1 %v969_v0 }
 0x159   :  { %778 = vmatpush3.bf16.msra.mxu1 %v837_v43 }
 0x20f   :  { %v282_v35 = vpop.f32.mrb[0].mxu1 }
 0x210   :  { %v283_v36 = vadd.f32 %v640_v34, %v282_v35  ;;  %v741_v37 = vpop.f32.mrb[1].mxu1 }
 0x211   :  { %v285_v38 = vpop.f32.mrb[2].mxu1 }
 0x212   :  { %v288_v39 = vmax.f32 %v283_v36, 0.0  ;;  %v742_v40 = vpop.f32.mrb[3].mxu1 }
 0x214   :  { %v289_v41 = vpack.c.bf16 %v288_v39, %v288_v39 }
 0x216   :  { %760 = vmatmul.mubr.bf16.vlgmr.msra.gmra.mrb[4].mxu0 %v289_v41 }
 0x217   :  { %799 = vmatprep.mubr.msk.bf16.mxu0 %vm970_vm0, %v969_v0  ;;  %784 = vmatpush3.bf16.msra.mxu0 %v838_v44 }
 0x218   :  { %785 = vmatprep.subr.bf16.mxu0 %v969_v0 }
 0x21b   :  { %786 = vmatpush3.bf16.msra.mxu0 %v839_v45 }
 0x21c   :  { %787 = vmatprep.subr.bf16.mxu0 %v969_v0 }
 0x21f   :  { %788 = vmatpush3.bf16.msra.mxu0 %v840_v46 }
 0x220   :  { %789 = vmatprep.subr.bf16.mxu0 %v969_v0 }
 0x223   :  { %790 = vmatpush3.bf16.msra.mxu0 %v841_v47 }
 0x224   :  { %791 = vmatprep.subr.bf16.mxu0 %v969_v0 }
 0x227   :  { %792 = vmatpush3.bf16.msra.mxu0 %v842_v48 }
 0x228   :  { %793 = vmatprep.subr.bf16.mxu0 %v969_v0 }
 0x22b   :  { %794 = vmatpush3.bf16.msra.mxu0 %v843_v49 }
 0x22c   :  { %795 = vmatprep.subr.bf16.mxu0 %v969_v0 }
 0x22f   :  { %796 = vmatpush3.bf16.msra.mxu0 %v844_v58 }
 0x230   :  { %797 = vmatprep.subr.bf16.mxu0 %v969_v0 }
 0x233   :  { %798 = vmatpush3.bf16.msra.mxu0 %v845_v59 }
 0x2e9   :  { %v395_v51 = vpop.f32.mrb[4].mxu0 }
 0x2ea   :  { %v396_v52 = vadd.f32 %v649_v50, %v395_v51  ;;  %v761_v53 = vpop.f32.mrb[5].mxu0 }
 0x2eb   :  { %v398_v54 = vpop.f32.mrb[6].mxu0 }
 0x2ec   :  { %v401_v55 = vmax.f32 %v396_v52, 0.0  ;;  %v762_v56 = vpop.f32.mrb[7].mxu0 }
 0x2ee   :  { %v402_v57 = vpack.c.bf16 %v401_v55, %v401_v55 }
 0x2f0   :  { %780 = vmatmul.mubr.bf16.vlgmr.msra.gmra.mrb[4].mxu1 %v402_v57 }
 0x3c3   :  { %v508_v61 = vpop.f32.mrb[4].mxu1 }
 0x3c4   :  { %v509_v62 = vadd.f32 %v658_v60, %v508_v61  ;;  %v781_v63 = vpop.f32.mrb[5].mxu1 }
 0x3c5   :  { %v511_v1 = vpop.f32.mrb[6].mxu1 }
 0x3c6   :  { %v514_v2 = vmax.f32 %v509_v62, 0.0  ;;  %v782_v3 = vpop.f32.mrb[7].mxu1 }
 0x3c8   :  { %v515_v4 = vpack.c.bf16 %v514_v2, %v514_v2 }
 0x3ca   :  { %800 = vmatmul.mubr.bf16.vlgmr.msra.gmra.mrb[8].mxu0 %v515_v4 }
 0x49d   :  { %v621_v6 = vpop.f32.mrb[8].mxu0 }
 0x49e   :  { %v622_v0 = vadd.f32 %v667_v5, %v621_v6  ;;  %v801_v7 = vpop.f32.mrb[9].mxu0 }
 0x49f   :  { %v624_v8 = vpop.f32.mrb[10].mxu0 }
 0x4a0   :  { %v627_v9 = vpack.c.bf16 %v622_v0, %v622_v0  ;;  %v802_v10 = vpop.f32.mrb[11].mxu0 }
 0x4a2   :  { %628 = vst [vmem:[%s1196_s11] sm:$0xf] %v627_v9 }
 0x4a3   :  { %633 = vsyncpa [#allocation3], 1 }
 0x4a4   :  { %634 = vsyncpa [#allocation5], 1 }
 0x4a5   :  { %635 = vsyncpa [#allocation8], 1 }

</bundles_post_ra>
